<compile_context>
chip_gen: v7x
topology: tpu7x:2x2x1
jax: 0.10.0
libtpu: 0.0.40
codegen_flags: <defaults>
</compile_context>

<pallas_src>
import functools

import jax
import jax.numpy as jnp
from jax.experimental import pallas as pl
from jax.experimental.pallas import tpu as pltpu


def _rope_kernel(x_ref, cos_ref, sin_ref, o_ref, *, d):
    """One sequence tile of RoPE.

    x_ref:   (TS, BH, D)  with D == d (rope-only blocks) or D == Dtot
    cos_ref: (TS, 1, d//2) float32
    sin_ref: (TS, 1, d//2) float32
    o_ref:   same block shape/dtype as x_ref
    """
    d2 = d // 2
    x = x_ref[...]

    x1 = x[..., :d2].astype(jnp.float32)
    x2 = x[..., d2:d].astype(jnp.float32)

    # Hoist the sublane broadcast: one explicit broadcast per tile, reused by
    # both products (JAX does not CSE implicit broadcast_in_dim).
    c = jnp.broadcast_to(cos_ref[...], x1.shape)
    s = jnp.broadcast_to(sin_ref[...], x1.shape)

    # Rotate-half with the sign folded into the +/-: no negate, no shuffle of x.
    h1 = x1 * c - x2 * s
    h2 = x2 * c + x1 * s

    parts = [h1.astype(o_ref.dtype), h2.astype(o_ref.dtype)]
    if x.shape[-1] > d:          # static: pass-through features live in this block
        parts.append(x[..., d:])
    # Single full-width store per tile (v5e has one vector-store slot).
    o_ref[...] = jnp.concatenate(parts, axis=-1)


def _choose_seq_tile(seq_len, rows, lanes, itemsize, target_bytes=4 * 1024 * 1024):
    """Pick a sequence-tile size so one (padded) x block is ~target_bytes."""
    lane_pad = -(-lanes // 128) * 128    # lane dim pads to a multiple of 128
    row_pad = -(-rows // 8) * 8          # sublane dim pads to a multiple of 8
    bytes_per_pos = row_pad * lane_pad * itemsize
    ts = max(1, target_bytes // bytes_per_pos)
    if ts >= 8:
        ts = (ts // 8) * 8
    return int(min(seq_len, ts))


@functools.partial(jax.jit, static_argnames=("d", "base"))
def rotary_positional_embeddings(x, d, base=10000):
    """Apply RoPE to the first `d` features of x; features [d:] pass through."""
    S, B, H, Dtot = x.shape
    assert d % 2 == 0 and d <= Dtot
    d2 = d // 2
    BH = B * H

    # ---- cos/sin cache, float32, exactly as the PyTorch module builds it ----
    theta = 1.0 / (base ** (jnp.arange(0, d, 2, dtype=jnp.float32) / d))  # (d/2,)
    pos = jnp.arange(S, dtype=jnp.float32)                                # (S,)
    ang = pos[:, None] * theta[None, :]                                   # (S, d/2)
    cos = jnp.cos(ang)[:, None, :]                                        # (S, 1, d/2)
    sin = jnp.sin(ang)[:, None, :]                                        # (S, 1, d/2)

    x3 = x.reshape(S, BH, Dtot)

    # If the rotated prefix is lane-tile aligned (or covers the whole feature
    # dim), blocks cover only the first d columns; the pass-through columns
    # stay untouched in HBM via input/output aliasing (halves HBM traffic).
    rope_only_blocks = (d == Dtot) or (d % 128 == 0)
    x_lanes = d if rope_only_blocks else Dtot

    ts = _choose_seq_tile(S, BH, x_lanes, jnp.dtype(x.dtype).itemsize)
    grid = (pl.cdiv(S, ts),)

    out = pl.pallas_call(
        functools.partial(_rope_kernel, d=d),
        out_shape=jax.ShapeDtypeStruct((S, BH, Dtot), x.dtype),
        grid_spec=pltpu.PrefetchScalarGridSpec(
            num_scalar_prefetch=0,
            grid=grid,
            in_specs=[
                pl.BlockSpec((ts, BH, x_lanes), lambda i: (i, 0, 0)),
                pl.BlockSpec((ts, 1, d2), lambda i: (i, 0, 0)),
                pl.BlockSpec((ts, 1, d2), lambda i: (i, 0, 0)),
            ],
            out_specs=pl.BlockSpec((ts, BH, x_lanes), lambda i: (i, 0, 0)),
        ),
        input_output_aliases={0: 0},   # output buffer is the (copied/donated) input
        compiler_params=pltpu.CompilerParams(
            dimension_semantics=("parallel",),
            vmem_limit_bytes=48 * 1024 * 1024,
        ),
    )(x3, cos, sin)

    return out.reshape(S, B, H, Dtot)


def _rope_reference(x, d, base=10000):
    """Pure-JAX reference mirroring the PyTorch forward."""
    S = x.shape[0]
    theta = 1.0 / (base ** (jnp.arange(0, d, 2, dtype=jnp.float32) / d))
    seq_idx = jnp.arange(S, dtype=jnp.float32)
    idx_theta = jnp.einsum("n,d->nd", seq_idx, theta)
    idx_theta2 = jnp.concatenate([idx_theta, idx_theta], axis=1)
    cos = jnp.cos(idx_theta2)[:, None, None, :]
    sin = jnp.sin(idx_theta2)[:, None, None, :]
    x_rope, x_pass = x[..., :d], x[..., d:]
    d2 = d // 2
    neg_half = jnp.concatenate([-x_rope[..., d2:], x_rope[..., :d2]], axis=-1)
    x_rope = x_rope * cos + neg_half * sin
    return jnp.concatenate([x_rope, x_pass], axis=-1).astype(x.dtype)


if __name__ == "__main__":
    key = jax.random.PRNGKey(0)

    cases = [
        # (S, B, H, Dtot, d) — small shapes; together they exercise both paths
        (8, 2, 4, 32, 16),      # partial rope, in-kernel pass-through copy
        (8, 2, 4, 32, 32),      # rope over the whole head dim
        (16, 2, 2, 256, 128),   # lane-aligned rope-only blocks + aliased pass-through
    ]
    for n, (S, B, H, Dtot, d_rope) in enumerate(cases):
        k = jax.random.fold_in(key, n)
        x = jax.random.normal(k, (S, B, H, Dtot), dtype=jnp.float32)

        out = jax.block_until_ready(rotary_positional_embeddings(x, d=d_rope))
        ref = _rope_reference(x, d_rope)

        assert out.shape == x.shape and out.dtype == x.dtype
        assert jnp.allclose(out, ref, atol=1e-5, rtol=1e-5), f"mismatch in case {n}"

    print("KERNEL_OK")
</pallas_src>

<mosaic_0001>
module attributes {stable_mosaic.version = 11 : i64} {
  func.func @_rope_kernel(%arg0: i32, %arg1: memref<8x8x32xf32, #tpu.memory_space<vmem>>, %arg2: memref<8x1x8xf32, #tpu.memory_space<vmem>>, %arg3: memref<8x1x8xf32, #tpu.memory_space<vmem>>, %arg4: memref<8x8x32xf32, #tpu.memory_space<vmem>>) attributes {dimension_semantics = [#tpu.dimension_semantics<parallel>], iteration_bounds = array<i64: 1>, scalar_prefetch = 0 : i64, scratch_operands = 0 : i64, tpu.core_type = #tpu.core_type<tc>, window_params = [{transform_indices = @transform_0, window_bounds = array<i64: 8, 8, 32>}, {transform_indices = @transform_1, window_bounds = array<i64: 8, 1, 8>}, {transform_indices = @transform_2, window_bounds = array<i64: 8, 1, 8>}, {transform_indices = @transform_3, window_bounds = array<i64: 8, 8, 32>}]} {
    %c0 = arith.constant 0 : index
    %c0_0 = arith.constant 0 : index
    %c0_1 = arith.constant 0 : index
    %0 = vector.load %arg1[%c0, %c0_0, %c0_1] : memref<8x8x32xf32, #tpu.memory_space<vmem>>, vector<8x8x32xf32>
    %1 = vector.extract_strided_slice %0 {offsets = [0, 0, 0], sizes = [8, 8, 8], strides = [1, 1, 1]} : vector<8x8x32xf32> to vector<8x8x8xf32>
    %2 = vector.extract_strided_slice %0 {offsets = [0, 0, 8], sizes = [8, 8, 8], strides = [1, 1, 1]} : vector<8x8x32xf32> to vector<8x8x8xf32>
    %c0_2 = arith.constant 0 : index
    %c0_3 = arith.constant 0 : index
    %c0_4 = arith.constant 0 : index
    %3 = vector.load %arg2[%c0_2, %c0_3, %c0_4] : memref<8x1x8xf32, #tpu.memory_space<vmem>>, vector<8x1x8xf32>
    %4 = vector.shape_cast %3 : vector<8x1x8xf32> to vector<8x1x8xf32>
    %5 = vector.broadcast %4 : vector<8x1x8xf32> to vector<8x8x8xf32>
    %c0_5 = arith.constant 0 : index
    %c0_6 = arith.constant 0 : index
    %c0_7 = arith.constant 0 : index
    %6 = vector.load %arg3[%c0_5, %c0_6, %c0_7] : memref<8x1x8xf32, #tpu.memory_space<vmem>>, vector<8x1x8xf32>
    %7 = vector.shape_cast %6 : vector<8x1x8xf32> to vector<8x1x8xf32>
    %8 = vector.broadcast %7 : vector<8x1x8xf32> to vector<8x8x8xf32>
    %9 = arith.mulf %1, %5 : vector<8x8x8xf32>
    %10 = arith.mulf %2, %8 : vector<8x8x8xf32>
    %11 = arith.subf %9, %10 : vector<8x8x8xf32>
    %12 = arith.mulf %2, %5 : vector<8x8x8xf32>
    %13 = arith.mulf %1, %8 : vector<8x8x8xf32>
    %14 = arith.addf %12, %13 : vector<8x8x8xf32>
    %15 = vector.extract_strided_slice %0 {offsets = [0, 0, 16], sizes = [8, 8, 16], strides = [1, 1, 1]} : vector<8x8x32xf32> to vector<8x8x16xf32>
    %16 = tpu.concatenate %11, %14, %15 in 2 : vector<8x8x8xf32>, vector<8x8x8xf32>, vector<8x8x16xf32> -> vector<8x8x32xf32>
    %c0_8 = arith.constant 0 : index
    %c0_9 = arith.constant 0 : index
    %c0_10 = arith.constant 0 : index
    %17 = vector.load %arg4[%c0_8, %c0_9, %c0_10] : memref<8x8x32xf32, #tpu.memory_space<vmem>>, vector<8x8x32xf32>
    tpu.vector_store %arg4[%c0_8, %c0_9, %c0_10], %16 {strides = array<i32>} : memref<8x8x32xf32, #tpu.memory_space<vmem>>, vector<8x8x32xf32>,
    return
  }
  func.func @transform_0(%arg0: i32) -> (i32, i32, i32) {
    %c0_i32 = arith.constant 0 : i32
    %c0_i32_0 = arith.constant 0 : i32
    %c0_i32_1 = arith.constant 0 : i32
    return %arg0, %c0_i32, %c0_i32_0 : i32, i32, i32
  }
  func.func @transform_1(%arg0: i32) -> (i32, i32, i32) {
    %c0_i32 = arith.constant 0 : i32
    %c0_i32_0 = arith.constant 0 : i32
    %c0_i32_1 = arith.constant 0 : i32
    return %arg0, %c0_i32, %c0_i32_0 : i32, i32, i32
  }
  func.func @transform_2(%arg0: i32) -> (i32, i32, i32) {
    %c0_i32 = arith.constant 0 : i32
    %c0_i32_0 = arith.constant 0 : i32
    %c0_i32_1 = arith.constant 0 : i32
    return %arg0, %c0_i32, %c0_i32_0 : i32, i32, i32
  }
  func.func @transform_3(%arg0: i32) -> (i32, i32, i32) {
    %c0_i32 = arith.constant 0 : i32
    %c0_i32_0 = arith.constant 0 : i32
    %c0_i32_1 = arith.constant 0 : i32
    return %arg0, %c0_i32, %c0_i32_0 : i32, i32, i32
  }
}

</mosaic_0001>

<bundles_post_ra>
// kernel: rotary_positional_embeddings.1
= control target key start
LH: loop header
LB: loop body
LE: loop exit
PB: predicated region body
PF: predicated region fallthrough
CT: control target
= control target key end

     0   :  { %s343_s16 = smov 8   ;;  %s344_s29 = smov 120   ;;  %vm294_vm0 = vcmask 64512   ;;  %vm303_vm1 = vcmask 130048   ;;  %vm312_vm2 = vcmask 261120   ;;  %s608_s2 = inlined_call_operand.vmem [shape: f32[8,1,8], index: 2, kind: input, shape index: {}]   ;;  %s609_s1 = inlined_call_operand.vmem [shape: f32[8,1,8], index: 1, kind: input, shape index: {}]   ;;  %s610_s0 = inlined_call_operand.vmem [shape: f32[8,8,32], index: 0, kind: input, shape index: {}, may-alias: {0,3}]   ;;  %s611_s3 = inlined_call_operand.vmem [shape: f32[8,8,32], index: 3, kind: output, shape index: {}, may-alias: {0,3}]  }
   0x1   :  { %v333_v0 = vld [vmem:[%s608_s2] ss:$0 sm:$0xff]  ;;  %v335_v1 = vld [vmem:[%s608_s2 + $0x2] ss:$0 sm:$0xff]  ;;  %v334_v2 = vld [vmem:[%s608_s2 + $0x1] ss:$0 sm:$0xff] }
   0x2   :  { %142 = vrot.lane.b32.xlu0 %v333_v0, %s343_s16  ;;  %146 = vrot.lane.b32.xlu1 %v335_v1, %s343_s16  ;;  %v336_v3 = vld [vmem:[%s608_s2 + $0x3] ss:$0 sm:$0xff]  ;;  %v337_v4 = vld [vmem:[%s608_s2 + $0x4] ss:$0 sm:$0xff] }
   0x3   :  { %v338_v5 = vld [vmem:[%s608_s2 + $0x5] ss:$0 sm:$0xff]  ;;  %v392_v6 = vld [vmem:[%s608_s2 + $0x6] ss:$0 sm:$0xff]  ;;  %v397_v7 = vld [vmem:[%s608_s2 + $0x7] ss:$0 sm:$0xff] }
   0x4   :  { %v406_v8 = vld [vmem:[%s609_s1 + $0x1] ss:$0 sm:$0xff]  ;;  %v411_v9 = vld [vmem:[%s609_s1] ss:$0 sm:$0xff]  ;;  %v420_v10 = vld [vmem:[%s609_s1 + $0x3] ss:$0 sm:$0xff] }
   0x5   :  { %v425_v11 = vld [vmem:[%s609_s1 + $0x2] ss:$0 sm:$0xff]  ;;  %v434_v12 = vld [vmem:[%s609_s1 + $0x5] ss:$0 sm:$0xff]  ;;  %v439_v13 = vld [vmem:[%s609_s1 + $0x4] ss:$0 sm:$0xff] }
   0x6   :  { %144 = vrot.lane.b32.xlu0 %v334_v2, %s343_s16  ;;  %148 = vrot.lane.b32.xlu1 %v336_v3, %s343_s16  ;;  %v444_v14 = vld [vmem:[%s610_s0] sm:$0xff]  ;;  %v453_v15 = vld [vmem:[%s610_s0 + $0x8] sm:$0xff] }
   0x7   :  { %v458_v16 = vld [vmem:[%s609_s1 + $0x7] ss:$0 sm:$0xff]  ;;  %v463_v17 = vld [vmem:[%s609_s1 + $0x6] ss:$0 sm:$0xff]  ;;  %v246_v18 = vmul.f32 %v333_v0, %v444_v14  ;;  %v247_v19 = vmul.f32 %v334_v2, %v453_v15  ;;  %v474_v20 = vld [vmem:[%s610_s0 + $0x10] sm:$0xff]  ;;  %v134_v62 = vmul.f32 %v411_v9, %v444_v14 }
   0x8   :  { %v479_v21 = vld [vmem:[%s610_s0 + $0x18] sm:$0xff]  ;;  %v248_v22 = vmul.f32 %v335_v1, %v474_v20  ;;  %v488_v24 = vld [vmem:[%s610_s0 + $0x20] sm:$0xff]  ;;  %v493_v25 = vld [vmem:[%s610_s0 + $0x28] sm:$0xff]  ;;  %v135_v1 = vmul.f32 %v406_v8, %v453_v15  ;;  %v136_v2 = vmul.f32 %v425_v11, %v474_v20 }
   0x9   :  { %v249_v23 = vmul.f32 %v336_v3, %v479_v21  ;;  %v250_v26 = vmul.f32 %v337_v4, %v488_v24  ;;  %v251_v27 = vmul.f32 %v338_v5, %v493_v25  ;;  %v509_v39 = vld [vmem:[%s610_s0 + $0x30] sm:$0xff]  ;;  %v515_v41 = vld [vmem:[%s610_s0 + $0x38] sm:$0xff] }
   0xa   :  { %150 = vrot.lane.b32.xlu0 %v337_v4, %s343_s16  ;;  %152 = vrot.lane.b32.xlu1 %v338_v5, %s343_s16  ;;  %v252_v45 = vmul.f32 %v392_v6, %v509_v39  ;;  %v253_v47 = vmul.f32 %v397_v7, %v515_v41 }
   0xe   :  { %154 = vrot.lane.b32.xlu0 %v392_v6, %s343_s16  ;;  %156 = vrot.lane.b32.xlu1 %v397_v7, %s343_s16 }
  0x12   :  { %216 = vrot.lane.b32.xlu1 %v406_v8, %s343_s16  ;;  %214 = vrot.lane.b32.xlu0 %v411_v9, %s343_s16  ;;  %v137_v9 = vmul.f32 %v420_v10, %v479_v21 }
  0x16   :  { %220 = vrot.lane.b32.xlu1 %v420_v10, %s343_s16  ;;  %218 = vrot.lane.b32.xlu0 %v425_v11, %s343_s16 }
  0x1a   :  { %224 = vrot.lane.b32.xlu1 %v434_v12, %s343_s16  ;;  %222 = vrot.lane.b32.xlu0 %v439_v13, %s343_s16 }
  0x1e   :  { %228 = vrot.lane.b32.xlu1 %v458_v16, %s343_s16  ;;  %226 = vrot.lane.b32.xlu0 %v463_v17, %s343_s16 }
  0x22   :  { %264 = vrot.lane.b32.xlu1 %v247_v19, %s343_s16  ;;  %262 = vrot.lane.b32.xlu0 %v246_v18, %s343_s16 }
  0x26   :  { %268 = vrot.lane.b32.xlu1 %v249_v23, %s343_s16  ;;  %266 = vrot.lane.b32.xlu0 %v248_v22, %s343_s16  ;;  %v138_v23 = vmul.f32 %v439_v13, %v488_v24 }
  0x2a   :  { %272 = vrot.lane.b32.xlu1 %v251_v27, %s343_s16  ;;  %270 = vrot.lane.b32.xlu0 %v250_v26, %s343_s16 }
  0x74   :  { %v143_v28 = vpop.permute.xlu0 %142  ;;  %v147_v29 = vpop.permute.xlu1 %146 }
  0x75   :  { %v166_v30 = vmul.f32 %v143_v28, %v444_v14  ;;  %v168_v31 = vmul.f32 %v147_v29, %v474_v20 }
  0x77   :  { %182 = vrot.lane.b32.xlu0 %v166_v30, %s344_s29 }
  0x78   :  { %v145_v32 = vpop.permute.xlu0 %144  ;;  %v149_v33 = vpop.permute.xlu1 %148 }
  0x79   :  { %v167_v34 = vmul.f32 %v145_v32, %v453_v15  ;;  %v169_v35 = vmul.f32 %v149_v33, %v479_v21 }
  0x7b   :  { %184 = vrot.lane.b32.xlu1 %v167_v34, %s344_s29  ;;  %186 = vrot.lane.b32.xlu0 %v168_v31, %s344_s29  ;;  %v139_v34 = vmul.f32 %v434_v12, %v493_v25  ;;  %v140_v12 = vmul.f32 %v463_v17, %v509_v39 }
  0x7c   :  { %v151_v36 = vpop.permute.xlu0 %150  ;;  %v153_v37 = vpop.permute.xlu1 %152 }
  0x7d   :  { %v170_v38 = vmul.f32 %v151_v36, %v488_v24  ;;  %v171_v40 = vmul.f32 %v153_v37, %v493_v25 }
  0x7f   :  { %188 = vrot.lane.b32.xlu1 %v169_v35, %s344_s29  ;;  %190 = vrot.lane.b32.xlu0 %v170_v38, %s344_s29 }
  0x80   :  { %v155_v42 = vpop.permute.xlu0 %154  ;;  %v157_v43 = vpop.permute.xlu1 %156 }
  0x81   :  { %v172_v44 = vmul.f32 %v155_v42, %v509_v39  ;;  %v173_v46 = vmul.f32 %v157_v43, %v515_v41 }
  0x83   :  { %192 = vrot.lane.b32.xlu1 %v171_v40, %s344_s29  ;;  %194 = vrot.lane.b32.xlu0 %v172_v44, %s344_s29 }
  0x84   :  { %v215_v48 = vpop.permute.xlu0 %214  ;;  %v217_v49 = vpop.permute.xlu1 %216 }
  0x85   :  { %v238_v61 = vmul.f32 %v215_v48, %v444_v14  ;;  %v239_v3 = vmul.f32 %v217_v49, %v453_v15 }
  0x87   :  { %196 = vrot.lane.b32.xlu1 %v173_v46, %s344_s29  ;;  %274 = vrot.lane.b32.xlu0 %v252_v45, %s343_s16 }
  0x88   :  { %v219_v50 = vpop.permute.xlu0 %218  ;;  %v221_v51 = vpop.permute.xlu1 %220 }
  0x89   :  { %v240_v4 = vmul.f32 %v219_v50, %v474_v20  ;;  %v241_v18 = vmul.f32 %v221_v51, %v479_v21  ;;  %v141_v50 = vmul.f32 %v458_v16, %v515_v41 }
  0x8b   :  { %276 = vrot.lane.b32.xlu1 %v253_v47, %s343_s16 }
  0x8c   :  { %v223_v52 = vpop.permute.xlu0 %222  ;;  %v225_v53 = vpop.permute.xlu1 %224 }
  0x8d   :  { %v242_v19 = vmul.f32 %v223_v52, %v488_v24 }
  0x90   :  { %v227_v54 = vpop.permute.xlu0 %226  ;;  %v525_v55 = vpop.permute.xlu1 %228 }
  0x91   :  { %v244_v46 = vmul.f32 %v227_v54, %v509_v39  ;;  %v245_v52 = vmul.f32 %v525_v55, %v515_v41 }
  0x94   :  { %v263_v56 = vpop.permute.xlu0 %262  ;;  %v265_v57 = vpop.permute.xlu1 %264 }
  0x95   :  { %v286_v5 = vadd.f32 %v263_v56, %v238_v61  ;;  %v287_v26 = vadd.f32 %v265_v57, %v239_v3 }
  0x98   :  { %v267_v58 = vpop.permute.xlu0 %266  ;;  %v269_v59 = vpop.permute.xlu1 %268 }
  0x99   :  { %v288_v27 = vadd.f32 %v267_v58, %v240_v4  ;;  %v289_v35 = vadd.f32 %v269_v59, %v241_v18 }
  0x9c   :  { %v271_v60 = vpop.permute.xlu0 %270  ;;  %v273_v63 = vpop.permute.xlu1 %272 }
  0x9d   :  { %v290_v36 = vadd.f32 %v271_v60, %v242_v19 }
  0xe9   :  { %v183_v0 = vpop.permute.xlu0 %182 }
  0xea   :  { %v206_v6 = vsub.f32 %v134_v62, %v183_v0 }
  0xec   :  { %v295_v7 = vsel %vm294_vm0, %v206_v6, %v286_v5 }
  0xed   :  { %v304_v8 = vsel %vm303_vm1, %v295_v7, %v444_v14  ;;  %v185_v11 = vpop.permute.xlu1 %184  ;;  %v187_v22 = vpop.permute.xlu0 %186  ;;  %v243_v14 = vmul.f32 %v225_v53, %v493_v25 }
  0xee   :  { %313 = vst.msk [vmem:[%s611_s3] sm:$0xff] %vm312_vm2, %v304_v8  ;;  %v207_v10 = vsub.f32 %v135_v1, %v185_v11  ;;  %v208_v28 = vsub.f32 %v136_v2, %v187_v22 }
  0xef   :  { %v291_v45 = vadd.f32 %v273_v63, %v243_v14 }
  0xf0   :  { %v296_v29 = vsel %vm294_vm0, %v207_v10, %v287_v26  ;;  %v297_v30 = vsel %vm294_vm0, %v208_v28, %v288_v27 }
  0xf1   :  { %v305_v31 = vsel %vm303_vm1, %v296_v29, %v453_v15  ;;  %v306_v13 = vsel %vm303_vm1, %v297_v30, %v474_v20  ;;  %v189_v32 = vpop.permute.xlu1 %188  ;;  %v191_v33 = vpop.permute.xlu0 %190 }
  0xf2   :  { %314 = vst.msk [vmem:[%s611_s3 + $0x8] sm:$0xff] %vm312_vm2, %v305_v31  ;;  %315 = vst.msk [vmem:[%s611_s3 + $0x10] sm:$0xff] %vm312_vm2, %v306_v13  ;;  %v209_v15 = vsub.f32 %v137_v9, %v189_v32  ;;  %v210_v37 = vsub.f32 %v138_v23, %v191_v33 }
  0xf4   :  { %v298_v20 = vsel %vm294_vm0, %v209_v15, %v289_v35  ;;  %v299_v38 = vsel %vm294_vm0, %v210_v37, %v290_v36 }
  0xf5   :  { %v307_v40 = vsel %vm303_vm1, %v298_v20, %v479_v21  ;;  %v308_v42 = vsel %vm303_vm1, %v299_v38, %v488_v24  ;;  %v193_v43 = vpop.permute.xlu1 %192  ;;  %v195_v44 = vpop.permute.xlu0 %194 }
  0xf6   :  { %316 = vst.msk [vmem:[%s611_s3 + $0x18] sm:$0xff] %vm312_vm2, %v307_v40  ;;  %317 = vst.msk [vmem:[%s611_s3 + $0x20] sm:$0xff] %vm312_vm2, %v308_v42  ;;  %v211_v17 = vsub.f32 %v139_v34, %v193_v43  ;;  %v212_v47 = vsub.f32 %v140_v12, %v195_v44 }
  0xf8   :  { %v300_v21 = vsel %vm294_vm0, %v211_v17, %v291_v45 }
  0xf9   :  { %v309_v24 = vsel %vm303_vm1, %v300_v21, %v493_v25  ;;  %v197_v48 = vpop.permute.xlu1 %196  ;;  %v275_v49 = vpop.permute.xlu0 %274 }
  0xfa   :  { %318 = vst.msk [vmem:[%s611_s3 + $0x28] sm:$0xff] %vm312_vm2, %v309_v24  ;;  %v292_v51 = vadd.f32 %v275_v49, %v244_v46  ;;  %v213_v56 = vsub.f32 %v141_v50, %v197_v48 }
  0xfc   :  { %v301_v53 = vsel %vm294_vm0, %v212_v47, %v292_v51 }
  0xfd   :  { %v310_v54 = vsel %vm303_vm1, %v301_v53, %v509_v39  ;;  %v277_v25 = vpop.permute.xlu1 %276 }
  0xfe   :  { %319 = vst.msk [vmem:[%s611_s3 + $0x30] sm:$0xff] %vm312_vm2, %v310_v54  ;;  %v293_v57 = vadd.f32 %v277_v25, %v245_v52 }
 0x100   :  { %v302_v58 = vsel %vm294_vm0, %v213_v56, %v293_v57 }
 0x101   :  { %v311_v16 = vsel %vm303_vm1, %v302_v58, %v515_v41 }
 0x102   :  { %320 = vst.msk [vmem:[%s611_s3 + $0x38] sm:$0xff] %vm312_vm2, %v311_v16 }

</bundles_post_ra>
